<compile_context>
chip_gen: v7x
topology: tpu7x:2x2x1
jax: 0.10.0
libtpu: 0.0.40
codegen_flags: <defaults>
</compile_context>

<pallas_src>
import jax
import jax.numpy as jnp
from jax.experimental import pallas as pl
from jax.experimental.pallas import tpu as pltpu  # noqa: F401  (TPU backend)

N = 16        # number of graph nodes
D = 32        # num_embeddings == out_channels (drug_embedding + embedding must match)
H = 32        # transformer hidden dim (3rd ctor arg of Transformer)
B = 8         # number of lookup indices in x
LAMDA = 0.8   # BGCNA lamda


# ---------------------------------------------------------------------------
# Kernel 1 (x-independent, compute once & cache):
#   proj  = E @ [Wq/sqrt(H) | Wk | WvWo | Wg]            (one (32,128) MXU pass)
#   drug  = softmax(QK^T + mask_bias) @ (E WvWo)         (gcn2 / Transformer)
#   gcn   = A' @ (E Wg) + bg,  A' = lamda*A_norm + (1-lamda)*I   (bgnn / BGCNA)
#   node  = drug + gcn                                   (dropout == identity, eval)
# ---------------------------------------------------------------------------
def node_embedding_kernel(emb_ref, adjp_ref, bias_ref, wfused_ref, bg_ref, node_ref):
    e = emb_ref[...]                                                   # (N, D)

    proj = jnp.dot(e, wfused_ref[...], preferred_element_type=jnp.float32)  # (N, 128)
    q = proj[:, :H]                                                    # (N, H), pre-scaled
    k = proj[:, H:2 * H]                                               # (N, H)
    ev = proj[:, 2 * H:2 * H + D]                                      # (N, D) == E @ (Wv Wo)
    eg = proj[:, 2 * H + D:]                                           # (N, D) == E @ Wg

    # attention scores: contract feature dims directly (no k.T materialization)
    s = jax.lax.dot_general(q, k, (((1,), (1,)), ((), ())),
                            preferred_element_type=jnp.float32)        # (N, N)
    s = s + bias_ref[...]                                              # additive edge mask
    s = s - jnp.max(s, axis=-1, keepdims=True)
    p = jnp.exp(s)
    p = p * pl.reciprocal(jnp.sum(p, axis=-1, keepdims=True), approx=False)
    drug = jnp.dot(p, ev, preferred_element_type=jnp.float32)          # (N, D)

    gcn = jnp.dot(adjp_ref[...], eg, preferred_element_type=jnp.float32) + bg_ref[...]

    node_ref[...] = (drug + gcn).astype(node_ref.dtype)                # (N, D)


# ---------------------------------------------------------------------------
# Kernel 2 (per forward call):
#   out = L2_normalize(one_hot(x) @ node_emb)            (F.embedding + F.normalize)
# ---------------------------------------------------------------------------
def lookup_normalize_kernel(idx_ref, node_ref, out_ref):
    idx = idx_ref[...]                                                 # (B, 1) int32
    node_ids = jax.lax.broadcasted_iota(jnp.int32, (idx.shape[0], N), 1)
    onehot = (idx == node_ids).astype(jnp.float32)                     # (B, N)
    rows = jnp.dot(onehot, node_ref[...], preferred_element_type=jnp.float32)  # (B, D)

    # F.normalize (L2 over feature dim, eps=1e-12 clamp on the norm) via rsqrt
    sumsq = jnp.sum(rows * rows, axis=-1, keepdims=True)
    inv = jax.lax.rsqrt(jnp.maximum(sumsq, 1e-24))
    out_ref[...] = (rows * inv).astype(out_ref.dtype)


# ---------------------------------------------------------------------------
# Wrappers
# ---------------------------------------------------------------------------
def compute_node_embedding(embedding, adj_prime, mask_bias, folded):
    """Heavy, x-independent part of forward. Cache the result across calls."""
    return pl.pallas_call(
        node_embedding_kernel,
        out_shape=jax.ShapeDtypeStruct((N, D), jnp.float32),
    )(embedding, adj_prime, mask_bias, folded["w_fused"], folded["bg"])


def lookup_normalize(x, node_emb):
    """Tiny per-call path: one-hot gather + L2 normalize."""
    idx = x.reshape(-1, 1).astype(jnp.int32)
    return pl.pallas_call(
        lookup_normalize_kernel,
        out_shape=jax.ShapeDtypeStruct((idx.shape[0], D), jnp.float32),
    )(idx, node_emb)


def neighbor_embedding_forward(x, embedding, adj_prime, mask_bias, folded,
                               node_emb=None):
    """Full forward; pass a cached node_emb to skip the x-independent work."""
    if node_emb is None:
        node_emb = compute_node_embedding(embedding, adj_prime, mask_bias, folded)
    return lookup_normalize(x, node_emb), node_emb


# ---------------------------------------------------------------------------
# One-time preprocessing (mirrors the module's register_buffer caching).
# ---------------------------------------------------------------------------
def prepare_graph(edge, lamda=LAMDA):
    """Dense adjacency from sparse COO, self loops, symmetric normalize,
    then fold the lamda mix into A' and the edge mask into an additive bias."""
    edge_index, edge_values, (n, _) = edge
    adj = jnp.zeros((n, n), jnp.float32).at[edge_index[0], edge_index[1]].add(edge_values)
    adj = adj + jnp.eye(n, dtype=jnp.float32)
    deg = jnp.sum(adj, axis=1)
    dinv = 1.0 / jnp.sqrt(jnp.maximum(deg, 1e-12))
    adj_norm = adj * dinv[:, None] * dinv[None, :]
    adj_prime = lamda * adj_norm + (1.0 - lamda) * jnp.eye(n, dtype=jnp.float32)
    mask_bias = jnp.where(adj > 0, 0.0, -1e9).astype(jnp.float32)
    return adj_prime, mask_bias


def fold_params(params):
    """One-time weight folding: [Wq/sqrt(H) | Wk | Wv@Wo | Wg] -> (D, 2H+2D)=(32,128)."""
    w_fused = jnp.concatenate(
        [params["wq"] * (1.0 / (H ** 0.5)),
         params["wk"],
         params["wv"] @ params["wo"],
         params["wg"]], axis=1)
    return {"w_fused": w_fused, "bg": params["bg"]}


if __name__ == "__main__":
    key = jax.random.PRNGKey(0)
    ks = jax.random.split(key, 8)

    # node features ("embedding" argument of forward)
    embedding = jax.random.normal(ks[0], (N, D), dtype=jnp.float32)

    # sparse COO edge: bidirectional ring graph on N nodes
    src = jnp.arange(N, dtype=jnp.int32)
    dst = (src + 1) % N
    edge_index = jnp.stack([jnp.concatenate([src, dst]),
                            jnp.concatenate([dst, src])]).astype(jnp.int32)
    edge_values = jnp.ones((2 * N,), jnp.float32)
    edge = (edge_index, edge_values, (N, N))

    # deterministic parameter init (shapes implied by the module ctor)
    params = {
        "wq": jax.random.normal(ks[1], (D, H), jnp.float32) / jnp.sqrt(D),
        "wk": jax.random.normal(ks[2], (D, H), jnp.float32) / jnp.sqrt(D),
        "wv": jax.random.normal(ks[3], (D, H), jnp.float32) / jnp.sqrt(D),
        "wo": jax.random.normal(ks[4], (H, D), jnp.float32) / jnp.sqrt(H),
        "wg": jax.random.normal(ks[5], (D, D), jnp.float32) / jnp.sqrt(D),
        "bg": jnp.zeros((1, D), jnp.float32),
    }

    # one-time precompute (cached in the torch module via register_buffer)
    adj_prime, mask_bias = prepare_graph(edge)
    folded = fold_params(params)

    # lookup indices ("x" argument of forward)
    x = jax.random.randint(ks[6], (B,), 0, N, dtype=jnp.int32)

    # first forward: runs the heavy x-independent kernel once + the per-call gather
    out, node_emb = neighbor_embedding_forward(x, embedding, adj_prime, mask_bias, folded)
    out = jax.block_until_ready(out)
    assert out.shape == (B, D) and out.dtype == jnp.float32

    # subsequent forwards with the same (embedding, graph, weights) reuse node_emb:
    # only the tiny gather + normalize kernel runs per call.
    x2 = jax.random.randint(ks[7], (B,), 0, N, dtype=jnp.int32)
    out2, _ = neighbor_embedding_forward(x2, embedding, adj_prime, mask_bias, folded,
                                         node_emb=node_emb)
    out2 = jax.block_until_ready(out2)
    assert out2.shape == (B, D) and out2.dtype == jnp.float32

    print("KERNEL_OK")
</pallas_src>

<mosaic_0001>
module attributes {stable_mosaic.version = 11 : i64} {
  func.func @node_embedding_kernel(%arg0: memref<16x32xf32, #tpu.memory_space<vmem>>, %arg1: memref<16x16xf32, #tpu.memory_space<vmem>>, %arg2: memref<16x16xf32, #tpu.memory_space<vmem>>, %arg3: memref<32x128xf32, #tpu.memory_space<vmem>>, %arg4: memref<1x32xf32, #tpu.memory_space<vmem>>, %arg5: memref<16x32xf32, #tpu.memory_space<vmem>>) attributes {dimension_semantics = [], scalar_prefetch = 0 : i64, scratch_operands = 0 : i64, tpu.core_type = #tpu.core_type<tc>} {
    %c0 = arith.constant 0 : index
    %c0_0 = arith.constant 0 : index
    %0 = vector.load %arg0[%c0, %c0_0] : memref<16x32xf32, #tpu.memory_space<vmem>>, vector<16x32xf32>
    %c0_1 = arith.constant 0 : index
    %c0_2 = arith.constant 0 : index
    %1 = vector.load %arg3[%c0_1, %c0_2] : memref<32x128xf32, #tpu.memory_space<vmem>>, vector<32x128xf32>
    %cst = arith.constant dense<0.000000e+00> : vector<16x128xf32>
    %2 = tpu.matmul %0, %1, %cst {dimension_numbers = #tpu.dot_dimension_numbers<[1], [0], [0], [1], [0, 0, 1, 1], [], []>} : vector<16x32xf32>, vector<32x128xf32>, vector<16x128xf32> -> vector<16x128xf32>
    %3 = vector.extract_strided_slice %2 {offsets = [0, 0], sizes = [16, 32], strides = [1, 1]} : vector<16x128xf32> to vector<16x32xf32>
    %4 = vector.extract_strided_slice %2 {offsets = [0, 32], sizes = [16, 32], strides = [1, 1]} : vector<16x128xf32> to vector<16x32xf32>
    %5 = vector.extract_strided_slice %2 {offsets = [0, 64], sizes = [16, 32], strides = [1, 1]} : vector<16x128xf32> to vector<16x32xf32>
    %6 = vector.extract_strided_slice %2 {offsets = [0, 96], sizes = [16, 32], strides = [1, 1]} : vector<16x128xf32> to vector<16x32xf32>
    %cst_3 = arith.constant dense<0.000000e+00> : vector<16x16xf32>
    %7 = tpu.matmul %3, %4, %cst_3 {dimension_numbers = #tpu.dot_dimension_numbers<[1], [1], [0], [0], [0, 0, 1, 0], [], []>} : vector<16x32xf32>, vector<16x32xf32>, vector<16x16xf32> -> vector<16x16xf32>
    %c0_4 = arith.constant 0 : index
    %c0_5 = arith.constant 0 : index
    %8 = vector.load %arg2[%c0_4, %c0_5] : memref<16x16xf32, #tpu.memory_space<vmem>>, vector<16x16xf32>
    %9 = arith.addf %7, %8 : vector<16x16xf32>
    %cst_6 = arith.constant dense<0xFF800000> : vector<16xf32>
    %10 = vector.multi_reduction <maximumf>, %9, %cst_6 [1] : vector<16x16xf32> to vector<16xf32>
    %11 = vector.shape_cast %10 : vector<16xf32> to vector<16x1xf32>
    %12 = vector.broadcast %11 : vector<16x1xf32> to vector<16x16xf32>
    %13 = arith.subf %9, %12 : vector<16x16xf32>
    %14 = math.exp %13 : vector<16x16xf32>
    %cst_7 = arith.constant dense<0.000000e+00> : vector<16xf32>
    %15 = vector.multi_reduction <add>, %14, %cst_7 [1] : vector<16x16xf32> to vector<16xf32>
    %16 = vector.shape_cast %15 : vector<16xf32> to vector<16x1xf32>
    %17 = tpu.reciprocal %16 : vector<16x1xf32> -> vector<16x1xf32>
    %18 = vector.broadcast %17 : vector<16x1xf32> to vector<16x16xf32>
    %19 = arith.mulf %14, %18 : vector<16x16xf32>
    %cst_8 = arith.constant dense<0.000000e+00> : vector<16x32xf32>
    %20 = tpu.matmul %19, %5, %cst_8 {dimension_numbers = #tpu.dot_dimension_numbers<[1], [0], [0], [1], [0, 0, 1, 1], [], []>} : vector<16x16xf32>, vector<16x32xf32>, vector<16x32xf32> -> vector<16x32xf32>
    %c0_9 = arith.constant 0 : index
    %c0_10 = arith.constant 0 : index
    %21 = vector.load %arg1[%c0_9, %c0_10] : memref<16x16xf32, #tpu.memory_space<vmem>>, vector<16x16xf32>
    %cst_11 = arith.constant dense<0.000000e+00> : vector<16x32xf32>
    %22 = tpu.matmul %21, %6, %cst_11 {dimension_numbers = #tpu.dot_dimension_numbers<[1], [0], [0], [1], [0, 0, 1, 1], [], []>} : vector<16x16xf32>, vector<16x32xf32>, vector<16x32xf32> -> vector<16x32xf32>
    %c0_12 = arith.constant 0 : index
    %c0_13 = arith.constant 0 : index
    %23 = vector.load %arg4[%c0_12, %c0_13] : memref<1x32xf32, #tpu.memory_space<vmem>>, vector<1x32xf32>
    %24 = vector.broadcast %23 : vector<1x32xf32> to vector<16x32xf32>
    %25 = arith.addf %22, %24 : vector<16x32xf32>
    %26 = arith.addf %20, %25 : vector<16x32xf32>
    %c0_14 = arith.constant 0 : index
    %c0_15 = arith.constant 0 : index
    %27 = vector.load %arg5[%c0_14, %c0_15] : memref<16x32xf32, #tpu.memory_space<vmem>>, vector<16x32xf32>
    tpu.vector_store %arg5[%c0_14, %c0_15], %26 {strides = array<i32>} : memref<16x32xf32, #tpu.memory_space<vmem>>, vector<16x32xf32>,
    return
  }
}

</mosaic_0001>

<bundles_post_ra>
// kernel: tpu_custom_call.1
= control target key start
LH: loop header
LB: loop body
LE: loop exit
PB: predicated region body
PF: predicated region fallthrough
CT: control target
= control target key end

     0   :  { %10 = vsyncpa [#allocation3], 0  ;;  %s868_s0 = inlined_call_operand.hbm [shape: f32[16,32], index: 0, kind: input, shape index: {}]   ;;  %s869_s1 = inlined_call_operand.hbm [shape: f32[16,16], index: 1, kind: input, shape index: {}]   ;;  %s870_s2 = inlined_call_operand.hbm [shape: f32[16,16], index: 2, kind: input, shape index: {}]   ;;  %s871_s3 = inlined_call_operand.hbm [shape: f32[32,128], index: 3, kind: input, shape index: {}]   ;;  %s872_s4 = inlined_call_operand.vmem [shape: f32[1,32], index: 4, kind: input, shape index: {}]   ;;  %s873_s5 = inlined_call_operand.hbm [shape: f32[16,32], index: 5, kind: output, shape index: {}]  }
   0x1   :  { %11 = vsyncpa [#allocation6], 0 }
   0x2   :  { %12 = vsyncpa [#allocation9], 0 }
   0x3   :  { %13 = vsyncpa [#allocation4], 0  ;;  %s720_s18 = smov [#allocation5]   ;;  %s721_s20 = smov [#allocation2]  }
   0x4   :  { %s31_s19 = sshll.u32 %s720_s18, 4  ;;  %s19_s21 = sshll.u32 %s721_s20, 4  ;;  %s32_s19 = int_to_ptr.vmem [resolvable:$true] %s31_s19  ;;  %s760_s21 = int_to_ptr.vmem [resolvable:$true] %s19_s21 }
   0x5   :  { %s602_s24 = scalar_lea.hbm %s869_s1, 256 }
   0x6   :  { %p603_p0 = scmp.ne.s32.totalorder %s869_s1, %s602_s24  ;;  %p606_p1 = scmp.lt.u32.totalorder %s602_s24, %s869_s1 }
   0x8   :  { %p608_p2 = pnand %p606_p1, %p603_p0 }
   0xa   :  { %611 = shalt.err (!%p608_p2)
}
   0xb   :  { %s612_s29 = scalar_lea.vmem %s32_s19, 256  ;;  %p617_p4 = scmp.lt.s32.totalorder %s32_s19, %s32_s19 }
   0xc   :  { %p613_p3 = scmp.ne.s32.totalorder %s32_s19, %s612_s29  ;;  %p618_p5 = scmp.lt.s32.totalorder %s612_s29, %s612_s29 }
   0xe   :  { %p619_p6 = por %p618_p5, %p617_p4 }
  0x10   :  { %p620_p7 = pnand %p619_p6, %p613_p3 }
  0x12   :  { %623 = shalt.err (!%p620_p7)
}
  0x13   :  { %s722_s30 = smov 128   ;;  %s723_s6 = smov 8  }
  0x14   :  { %37 = dma.hbm_to_vmem [thread:$0]  %s869_s1, 256, %s32_s19, [#allocation6], %s722_s30, %s722_s30, %s723_s6  }
  0x15   :  { %s624_s11 = scalar_lea.hbm %s868_s0, 256 }
  0x16   :  { %p625_p8 = scmp.ne.s32.totalorder %s868_s0, %s624_s11  ;;  %p628_p9 = scmp.lt.u32.totalorder %s624_s11, %s868_s0 }
  0x18   :  { %p630_p10 = pnand %p628_p9, %p625_p8 }
  0x1a   :  { %633 = shalt.err (!%p630_p10)
}
  0x1b   :  { %s634_s16 = scalar_lea.vmem %s760_s21, 256  ;;  %p639_p12 = scmp.lt.s32.totalorder %s760_s21, %s760_s21 }
  0x1c   :  { %p635_p11 = scmp.ne.s32.totalorder %s760_s21, %s634_s16  ;;  %p640_p13 = scmp.lt.s32.totalorder %s634_s16, %s634_s16 }
  0x1e   :  { %p641_p0 = por %p640_p13, %p639_p12 }
  0x20   :  { %p642_p1 = pnand %p641_p0, %p635_p11 }
  0x22   :  { %645 = shalt.err (!%p642_p1)
}
  0x23   :  { %25 = dma.hbm_to_vmem [thread:$0]  %s868_s0, 256, %s760_s21, [#allocation3], %s722_s30, %s722_s30, %s723_s6  }
  0x24   :  { %s724_s18 = smov [#allocation7]   ;;  %s725_s20 = smov [#allocation8]  }
  0x25   :  { %s43_s19 = sshll.u32 %s724_s18, 4  ;;  %s55_s22 = sshll.u32 %s725_s20, 4  ;;  %s44_s19 = int_to_ptr.vmem [resolvable:$true] %s43_s19  ;;  %s797_s22 = int_to_ptr.vmem [resolvable:$true] %s55_s22 }
  0x26   :  { %s646_s25 = scalar_lea.hbm %s870_s2, 256 }
  0x27   :  { %p647_p2 = scmp.ne.s32.totalorder %s870_s2, %s646_s25  ;;  %p650_p3 = scmp.lt.u32.totalorder %s646_s25, %s870_s2 }
  0x29   :  { %p652_p4 = pnand %p650_p3, %p647_p2 }
  0x2b   :  { %655 = shalt.err (!%p652_p4)
}
  0x2c   :  { %s656_s0 = scalar_lea.vmem %s44_s19, 256  ;;  %p661_p6 = scmp.lt.s32.totalorder %s44_s19, %s44_s19 }
  0x2d   :  { %p657_p5 = scmp.ne.s32.totalorder %s44_s19, %s656_s0  ;;  %p662_p7 = scmp.lt.s32.totalorder %s656_s0, %s656_s0 }
  0x2f   :  { %p663_p8 = por %p662_p7, %p661_p6 }
  0x31   :  { %p664_p9 = pnand %p663_p8, %p657_p5 }
  0x33   :  { %667 = shalt.err (!%p664_p9)
}
  0x34   :  { %49 = dma.hbm_to_vmem [thread:$0]  %s870_s2, 256, %s44_s19, [#allocation6], %s722_s30, %s722_s30, %s723_s6  }
  0x35   :  { %s668_s10 = scalar_lea.hbm %s871_s3, 512 }
  0x36   :  { %p669_p10 = scmp.ne.s32.totalorder %s871_s3, %s668_s10  ;;  %p672_p11 = scmp.lt.u32.totalorder %s668_s10, %s871_s3 }
  0x38   :  { %p674_p12 = pnand %p672_p11, %p669_p10 }
  0x3a   :  { %677 = shalt.err (!%p674_p12)
}
  0x3b   :  { %s678_s15 = scalar_lea.vmem %s797_s22, 512  ;;  %p683_p0 = scmp.lt.s32.totalorder %s797_s22, %s797_s22 }
  0x3c   :  { %p679_p13 = scmp.ne.s32.totalorder %s797_s22, %s678_s15  ;;  %p684_p1 = scmp.lt.s32.totalorder %s678_s15, %s678_s15 }
  0x3e   :  { %p685_p2 = por %p684_p1, %p683_p0 }
  0x40   :  { %p686_p3 = pnand %p685_p2, %p679_p13 }
  0x42   :  { %689 = shalt.err (!%p686_p3)
}
  0x43   :  { %61 = dma.hbm_to_vmem [thread:$0]  %s871_s3, 512, %s797_s22, [#allocation9], %s722_s30, %s722_s30, %s723_s6  }
  0x44   :  { %712 = dma.done.wait [#allocation3], 256  }
  0x45   :  { %713 = vsyncadd [#allocation3], 4294967040 }
  0x46   :  { %714 = dma.done.wait [#allocation6], 512  }
  0x47   :  { %715 = vsyncadd [#allocation6], 4294966784 }
  0x48   :  { %716 = dma.done.wait [#allocation9], 512  }
  0x49   :  { %717 = vsyncadd [#allocation9], 4294966784  ;;  %vm82_vm0 = vcmask 261120   ;;  %v78_v0 = vld [vmem:[#allocation8] sm:$0xff]  ;;  %v79_v1 = vld [vmem:[#allocation8 + $0x8] sm:$0xff]  ;;  %s726_s3 = smov 96  }
  0x4a   :  { %v80_v2 = vld [vmem:[#allocation8 + $0x10] sm:$0xff]  ;;  %v543_v3 = vpack.c.bf16 %v79_v1, %v78_v0  ;;  %v81_v4 = vld [vmem:[#allocation8 + $0x18] sm:$0xff]  ;;  %vm552_vm1 = vmpackc.low %vm82_vm0, %vm82_vm0  ;;  %vm255_vm2 = vcmask 130048   ;;  %s727_s1 = smov 32   ;;  %s728_s17 = smov 64  }
  0x4b   :  { %v76_v5 = vld [vmem:[#allocation2] sm:$0xff]  ;;  %v547_v6 = vpack.c.bf16 %v81_v4, %v80_v2  ;;  %v77_v7 = vld [vmem:[#allocation2 + $0x8] sm:$0xff]  ;;  %v278_v37 = vld [vmem:[#allocation5] sm:$0xff]  ;;  %s729_s20 = smov [#allocation10]  }
  0x4c   :  { %519 = vmatprep.mubr.msk.f32.mxu0 %vm82_vm0, %v76_v5  ;;  %544 = vmatprep.subr.bf16.mxu0 %v543_v3  ;;  %v165_v15 = vld [vmem:[#allocation7 + $0x8] sm:$0xff]  ;;  %v164_v16 = vld [vmem:[#allocation7] sm:$0xff]  ;;  %v279_v38 = vld [vmem:[#allocation5 + $0x8] sm:$0xff]  ;;  %s468_s22 = sshll.u32 %s729_s20, 4  ;;  %s469_s22 = int_to_ptr.vmem [resolvable:$true] %s468_s22 }
  0x4d   :  { %546 = vmatpush3.bf16.msra.mxu0 %v543_v3  ;;  %v488_v51 = vld [vmem:[%s872_s4] ss:$0 sm:$0xff]  ;;  %s690_s23 = scalar_lea.vmem %s469_s22, 256  ;;  %p695_p5 = scmp.lt.s32.totalorder %s469_s22, %s469_s22 }
  0x4e   :  { %548 = vmatprep.subr.bf16.mxu0 %v547_v6  ;;  %p691_p4 = scmp.ne.s32.totalorder %s469_s22, %s690_s23  ;;  %p696_p6 = scmp.lt.s32.totalorder %s690_s23, %s690_s23 }
  0x50   :  { %p697_p7 = por %p696_p6, %p695_p5 }
  0x51   :  { %550 = vmatpush3.bf16.msra.mxu0 %v547_v6 }
  0x52   :  { %p698_p8 = pnand %p697_p7, %p691_p4 }
  0x54   :  { %520 = vmatmul.mubr.msk.f32.vlgmr.msra.gmra.mrb[0].mxu0 %vm82_vm0, %v77_v7 }
 0x127   :  { %v521_v8 = vpop.f32.mrb[0].mxu0 }
 0x128   :  { %v155_v9 = vpop.f32.mrb[1].mxu0 }
 0x129   :  { %526 = vmatprep.mubr.msk.f32.mxu1 %vm82_vm0, %v155_v9  ;;  %v579_v10 = vpack.i.bf16 %v521_v8, %v155_v9 }
 0x12b   :  { %580 = vrot.lane.b32.xlu0 %v579_v10, %s726_s3 }
 0x19d   :  { %v581_v11 = vpop.permute.xlu0 %580 }
 0x19e   :  { %v583_v12 = vunpack.i.h.bf16 %v581_v11  ;;  %v582_v13 = vunpack.i.l.bf16 %v581_v11 }
 0x1a0   :  { %v551_v14 = vpack.c.bf16 %v583_v12, %v582_v13 }
 0x1a2   :  { %553 = vmatprep.subr.msk.bf16.mxu1 %vm552_vm1, %v551_v14 }
 0x1a3   :  { %556 = vmatpush3.bf16.xpose.msk.msra.mxu1 %vm552_vm1, %v551_v14 }
 0x1aa   :  { %527 = vmatmul.mubr.msk.f32.vlgmr.msra.gmra.mrb[0].mxu1 %vm82_vm0, %v521_v8 }
 0x1ab   :  { %533 = vmatprep.mubr.msk.f32.mxu1 %vm255_vm2, %v278_v37 }
 0x27d   :  { %v528_v17 = vpop.f32.mrb[0].mxu1 }
 0x27e   :  { %v252_v18 = vadd.f32 %v528_v17, %v165_v15  ;;  %v246_v19 = vpop.f32.mrb[1].mxu1 }
 0x27f   :  { %v247_v20 = vadd.f32 %v246_v19, %v164_v16 }
 0x280   :  { %v259_v21 = vsel %vm255_vm2, %v252_v18, -inf }
 0x281   :  { %260 = vmax.xlane.f32.xlu1 %v259_v21  ;;  %v256_v22 = vsel %vm255_vm2, %v247_v20, -inf }
 0x282   :  { %257 = vmax.xlane.f32.xlu0 %v256_v22 }
 0x292   :  { %585 = vrot.lane.b32.xlu1 %v579_v10, %s727_s1 }
 0x30e   :  { %v261_v23 = vpop.xlane.xlu1 %260 }
 0x30f   :  { %v263_v24 = vsub.f32 %v252_v18, %v261_v23  ;;  %v258_v25 = vpop.xlane.xlu0 %257 }
 0x310   :  { %v262_v26 = vsub.f32 %v247_v20, %v258_v25 }
 0x311   :  { %v266_v27 = vmul.f32 1.442695, %v263_v24 }
 0x312   :  { %v264_v28 = vmul.f32 1.442695, %v262_v26  ;;  %v586_v29 = vpop.permute.xlu1 %585 }
 0x313   :  { %594 = vpow2.f32 %v266_v27  ;;  %v588_v30 = vunpack.i.h.bf16 %v586_v29  ;;  %v587_v31 = vunpack.i.l.bf16 %v586_v29 }
 0x314   :  { %596 = vpow2.f32 %v264_v28 }
 0x315   :  { %v557_v32 = vpack.c.bf16 %v588_v30, %v587_v31 }
 0x317   :  { %558 = vmatprep.subr.bf16.mxu1 %v557_v32 }
 0x318   :  { %560 = vmatpush3.bf16.msra.mxu1 %v557_v32 }
 0x31b   :  { %534 = vmatmul.mubr.msk.f32.vlgmr.msra.gmra.mrb[2].mxu1 %vm255_vm2, %v279_v38 }
 0x31d   :  { %v595_v33 = vpop.eup %594 }
 0x31e   :  { %v271_v34 = vsel %vm255_vm2, %v595_v33, 0.0  ;;  %v597_v35 = vpop.eup %596 }
 0x31f   :  { %272 = vadd.xlane.f32.xlu1 %v271_v34  ;;  %v268_v36 = vsel %vm255_vm2, %v597_v35, 0.0 }
 0x323   :  { %269 = vadd.xlane.f32.xlu1 %v268_v36 }
 0x334   :  { %590 = vrot.lane.b32.xlu1 %v579_v10, %s728_s17 }
 0x3ac   :  { %v273_v39 = vpop.xlane.xlu1 %272 }
 0x3ad   :  { %598 = vrcp.f32 %v273_v39 }
 0x3b0   :  { %v270_v40 = vpop.xlane.xlu1 %269 }
 0x3b1   :  { %600 = vrcp.f32 %v270_v40 }
 0x3b4   :  { %v591_v41 = vpop.permute.xlu1 %590 }
 0x3b5   :  { %v593_v42 = vunpack.i.h.bf16 %v591_v41  ;;  %v592_v43 = vunpack.i.l.bf16 %v591_v41 }
 0x3b7   :  { %v561_v44 = vpack.c.bf16 %v593_v42, %v592_v43  ;;  %v599_v45 = vpop.eup %598 }
 0x3b8   :  { %v277_v48 = vmul.f32 %v599_v45, %v595_v33 }
 0x3b9   :  { %562 = vmatprep.subr.bf16.mxu0 %v561_v44 }
 0x3ba   :  { %564 = vmatpush3.bf16.msra.mxu0 %v561_v44 }
 0x3bb   :  { %v601_v46 = vpop.eup %600 }
 0x3bc   :  { %v276_v47 = vmul.f32 %v601_v46, %v597_v35 }
 0x3be   :  { %540 = vmatprep.mubr.msk.f32.mxu0 %vm255_vm2, %v276_v47 }
 0x3bf   :  { %541 = vmatmul.mubr.msk.f32.vlgmr.msra.gmra.mrb[2].mxu0 %vm255_vm2, %v277_v48 }
 0x3ee   :  { %v535_v49 = vpop.f32.mrb[2].mxu1 }
 0x3ef   :  { %v365_v50 = vpop.f32.mrb[3].mxu1  ;;  %v371_v52 = vadd.f32 %v535_v49, %v488_v51 }
 0x3f0   :  { %v366_v53 = vadd.f32 %v488_v51, %v365_v50 }
 0x492   :  { %v542_v54 = vpop.f32.mrb[2].mxu0 }
 0x493   :  { %v458_v55 = vadd.f32 %v542_v54, %v371_v52  ;;  %v452_v56 = vpop.f32.mrb[3].mxu0 }
 0x494   :  { %v453_v57 = vadd.f32 %v452_v56, %v366_v53 }
 0x495   :  { %462 = vst.msk [vmem:[#allocation10 + $0x8] sm:$0xff] %vm82_vm0, %v458_v55 }
 0x496   :  { %461 = vst.msk [vmem:[#allocation10] sm:$0xff] %vm82_vm0, %v453_v57 }
 0x497   :  { %701 = shalt.err (!%p698_p8)
}
 0x498   :  { %s702_s25 = scalar_lea.hbm %s873_s5, 256 }
 0x499   :  { %p703_p9 = scmp.ne.s32.totalorder %s873_s5, %s702_s25  ;;  %p706_p10 = scmp.lt.u32.totalorder %s702_s25, %s873_s5 }
 0x49b   :  { %p708_p11 = pnand %p706_p10, %p703_p9 }
 0x49d   :  { %711 = shalt.err (!%p708_p11)
}
 0x49e   :  { %474 = dma.vmem_to_hbm [thread:$0]  %s469_s22, 256, %s873_s5, [#allocation4], %s722_s30, %s722_s30, %s723_s6  }
 0x49f   :  { %718 = dma.done.wait [#allocation4], 256  }
 0x4a0   :  { %719 = vsyncadd [#allocation4], 4294967040 }
 0x4a1   :  { %478 = vsyncpa [#allocation3], 1 }
 0x4a2   :  { %479 = vsyncpa [#allocation6], 1 }
 0x4a3   :  { %480 = vsyncpa [#allocation9], 1 }
 0x4a4   :  { %481 = vsyncpa [#allocation4], 1 }

</bundles_post_ra>
